<compile_context>
chip_gen: v7x
topology: tpu7x:2x2x1
jax: 0.10.0
libtpu: 0.0.40
codegen_flags: <defaults>
</compile_context>

<pallas_src>
import functools
from collections import namedtuple

import jax
import jax.numpy as jnp
from jax import lax
from jax.experimental import pallas as pl
from jax.experimental.pallas import tpu as pltpu

LossTuple = namedtuple(
    "LossTuple",
    ["rpn_loc_loss", "rpn_cls_loss", "roi_loc_loss", "roi_cls_loss",
     "total_loss", "total_rpn", "total_roi"],
)


def _round_up(x, m):
    return ((x + m - 1) // m) * m


def _fused_loss_kernel(rpn_ref, roi_locgt_ref, roi_lab_ref, roi_sc_ref,
                       out_ref, acc_loc_ref, acc_ce_ref, acc_val_ref, *,
                       sig2_rpn, sig2_roi):
    """One lane-tile of RPN anchors + (on the last step) the whole ROI block.

    rpn_ref        : (11, tn) f32  transposed RPN pack:
                     rows 0:4 pred, 4:8 gt, 8 label(-1/0/1), 9:11 scores
    roi_locgt_ref  : (R_pad, 8) f32  [roi_loc | gt_roi_loc], grid-resident
    roi_lab_ref    : (R_pad, 1) i32  (-1 for padded rows)
    roi_sc_ref     : (R_pad, C) f32  ROI class logits (natural width)
    out_ref        : (8,) f32 SMEM   the 7 LossTuple scalars
    acc_*          : VMEM per-lane accumulators, persist across the grid
    """
    i = pl.program_id(0)

    @pl.when(i == 0)
    def _init():
        acc_loc_ref[...] = jnp.zeros_like(acc_loc_ref)
        acc_ce_ref[...] = jnp.zeros_like(acc_ce_ref)
        acc_val_ref[...] = jnp.zeros_like(acc_val_ref)

    # ---- RPN tile: fields on sublanes, anchors on lanes (fully dense) ------
    pred = rpn_ref[0:4, :]                       # (4, tn)
    gt = rpn_ref[4:8, :]                         # (4, tn)
    lab = rpn_ref[8:9, :]                        # (1, tn) float -1/0/1
    s0 = rpn_ref[9:10, :]                        # (1, tn)
    s1 = rpn_ref[10:11, :]                       # (1, tn)

    pos = (lab > 0.5).astype(jnp.float32)        # in_weight
    valid = (lab > -0.5).astype(jnp.float32)     # normalizer / CE mask

    # smooth-L1 loc loss (masking before the loss, exactly like the reference)
    diff = (pred - gt) * pos                     # (4, tn), broadcast over rows
    ad = jnp.abs(diff)
    flag = (ad < 1.0 / sig2_rpn).astype(jnp.float32)
    y = flag * (0.5 * sig2_rpn) * diff * diff + (1.0 - flag) * (ad - 0.5 / sig2_rpn)
    acc_loc_ref[...] += y

    # 2-class closed-form cross entropy: lse(s0, s1) - s_label
    mx = jnp.maximum(s0, s1)
    lse2 = mx + jnp.log(jnp.exp(s0 - mx) + jnp.exp(s1 - mx))
    sel = jnp.where(lab > 0.5, s1, s0)
    acc_ce_ref[...] += (lse2 - sel) * valid
    acc_val_ref[...] += valid

    # ---- epilogue: cross-lane reductions + tiny ROI block + normalization --
    @pl.when(i == pl.num_programs(0) - 1)
    def _finalize():
        rpn_loc_sum = jnp.sum(acc_loc_ref[...])
        rpn_ce_sum = jnp.sum(acc_ce_ref[...])
        rpn_valid = jnp.sum(acc_val_ref[...])

        # ROI smooth-L1 loc loss
        r_pred = roi_locgt_ref[:, 0:4]
        r_gt = roi_locgt_ref[:, 4:8]
        r_lab = roi_lab_ref[...]                             # (R_pad, 1) i32
        r_pos = (r_lab > 0).astype(jnp.float32)
        r_valid = (r_lab >= 0).astype(jnp.float32)

        r_diff = (r_pred - r_gt) * r_pos
        r_ad = jnp.abs(r_diff)
        r_flag = (r_ad < 1.0 / sig2_roi).astype(jnp.float32)
        r_y = (r_flag * (0.5 * sig2_roi) * r_diff * r_diff
               + (1.0 - r_flag) * (r_ad - 0.5 / sig2_roi))
        roi_loc_sum = jnp.sum(r_y)

        # ROI cross entropy at natural class width (no padded lanes)
        sc = roi_sc_ref[...]                                 # (R_pad, C)
        col = lax.broadcasted_iota(jnp.int32, sc.shape, 1)
        m = jnp.max(sc, axis=-1, keepdims=True)
        lse = m + jnp.log(jnp.sum(jnp.exp(sc - m), axis=-1, keepdims=True))
        sel_r = jnp.sum(jnp.where(col == r_lab, sc, 0.0), axis=-1, keepdims=True)
        roi_ce_sum = jnp.sum((lse - sel_r) * r_valid)
        roi_valid = jnp.sum(r_valid)

        # NOTE: if a segment has zero valid labels this divides by zero (NaN),
        # matching the PyTorch reference; not guarded on purpose.
        rpn_loc = rpn_loc_sum / rpn_valid
        rpn_cls = rpn_ce_sum / rpn_valid
        roi_loc = roi_loc_sum / roi_valid
        roi_cls = roi_ce_sum / roi_valid
        total_rpn = rpn_loc + rpn_cls
        total_roi = roi_loc + roi_cls
        out_ref[0] = rpn_loc
        out_ref[1] = rpn_cls
        out_ref[2] = roi_loc
        out_ref[3] = roi_cls
        out_ref[4] = total_rpn + total_roi
        out_ref[5] = total_rpn
        out_ref[6] = total_roi
        out_ref[7] = 0.0


class FasterRCNNTrainerLosses:
    """JAX/Pallas equivalent of the loss computation inside step1..step4."""

    # TODO(synk): faster_rcnn.extractor/rpn/head conv nets, AnchorTargetCreator,
    # ProposalTargetCreator (NMS / numpy target assignment), the SGD optimizer
    # step and the meters/ConfusionMeter bookkeeping have no single-kernel
    # Pallas equivalent; this class consumes their outputs and computes the
    # LossTuple exactly as the PyTorch module does.
    def __init__(self, rpn_sigma=3.0, roi_sigma=1.0, anchor_tile=2048):
        assert anchor_tile % 128 == 0, "anchor_tile must be a multiple of 128"
        self.rpn_sigma = float(rpn_sigma)
        self.roi_sigma = float(roi_sigma)
        self.anchor_tile = int(anchor_tile)
        self.loc_normalize_mean = (0.0, 0.0, 0.0, 0.0)
        self.loc_normalize_std = (0.1, 0.1, 0.2, 0.2)

    def __call__(self, rpn_loc, gt_rpn_loc, gt_rpn_label, rpn_score,
                 roi_cls_loc, gt_roi_loc, gt_roi_label, roi_score):
        # Per-ROI class gather roi_cls_loc[arange(n), gt_roi_label] -- same tiny
        # gather the PyTorch module performs before the loss (done in XLA).
        n_sample = roi_cls_loc.shape[0]
        roi_loc = jnp.take_along_axis(
            roi_cls_loc.reshape(n_sample, -1, 4),
            gt_roi_label.astype(jnp.int32)[:, None, None], axis=1)[:, 0, :]

        A = rpn_score.shape[0]
        R, c_roi = roi_score.shape
        tn = self.anchor_tile
        a_pad = _round_up(max(A, tn), tn)
        r_pad = _round_up(R, 8)
        pa = a_pad - A
        pr = r_pad - R

        # RPN: one transposed, lane-dense pack (11, A_pad).  Padded anchors get
        # label -1 (ignored) and zeros elsewhere.  This is the only wrapper
        # relayout; everything else is already lane-dense / tiny.
        rpn_packed = jnp.concatenate([
            jnp.pad(rpn_loc.astype(jnp.float32).T, ((0, 0), (0, pa))),
            jnp.pad(gt_rpn_loc.astype(jnp.float32).T, ((0, 0), (0, pa))),
            jnp.pad(gt_rpn_label.astype(jnp.float32)[None, :], ((0, 0), (0, pa)),
                    constant_values=-1.0),
            jnp.pad(rpn_score.astype(jnp.float32).T, ((0, 0), (0, pa))),
        ], axis=0)                                            # (11, a_pad)

        roi_locgt = jnp.pad(
            jnp.concatenate([roi_loc.astype(jnp.float32),
                             gt_roi_loc.astype(jnp.float32)], axis=1),
            ((0, pr), (0, 0)))                                # (r_pad, 8)
        roi_lab = jnp.pad(gt_roi_label.astype(jnp.int32), (0, pr),
                          constant_values=-1)[:, None]        # (r_pad, 1)
        roi_sc = jnp.pad(roi_score.astype(jnp.float32),
                         ((0, pr), (0, 0)))                   # (r_pad, c_roi)

        kernel = functools.partial(_fused_loss_kernel,
                                   sig2_rpn=self.rpn_sigma ** 2,
                                   sig2_roi=self.roi_sigma ** 2)

        bytes_accessed = int(4 * (rpn_packed.size + roi_locgt.size
                                  + roi_lab.size + roi_sc.size) + 32)
        cost = pl.CostEstimate(
            flops=int(40 * a_pad + 12 * r_pad * (c_roi + 8)),
            transcendentals=int(3 * a_pad + 2 * r_pad * c_roi),
            bytes_accessed=bytes_accessed)

        out = pl.pallas_call(
            kernel,
            grid=(a_pad // tn,),
            in_specs=[
                pl.BlockSpec((11, tn), lambda i: (0, i)),
                pl.BlockSpec((r_pad, 8), lambda i: (0, 0)),
                pl.BlockSpec((r_pad, 1), lambda i: (0, 0)),
                pl.BlockSpec((r_pad, c_roi), lambda i: (0, 0)),
            ],
            out_specs=pl.BlockSpec(memory_space=pltpu.MemorySpace.SMEM),
            out_shape=jax.ShapeDtypeStruct((8,), jnp.float32),
            scratch_shapes=[pltpu.VMEM((4, tn), jnp.float32),
                            pltpu.VMEM((1, tn), jnp.float32),
                            pltpu.VMEM((1, tn), jnp.float32)],
            compiler_params=pltpu.CompilerParams(
                dimension_semantics=("arbitrary",)),
            cost_estimate=cost,
        )(rpn_packed, roi_locgt, roi_lab, roi_sc)

        return LossTuple(out[0], out[1], out[2], out[3], out[4], out[5], out[6])


# ---------------------------- plain-JAX reference ----------------------------
def _ref_loc_loss(pred, gt, label, sigma):
    sigma2 = sigma ** 2
    w = (label > 0).astype(jnp.float32)[:, None] * jnp.ones((1, 4), jnp.float32)
    diff = w * (pred - gt)
    ad = jnp.abs(diff)
    flag = (ad < 1.0 / sigma2).astype(jnp.float32)
    y = flag * (sigma2 / 2.0) * diff ** 2 + (1.0 - flag) * (ad - 0.5 / sigma2)
    return jnp.sum(y) / jnp.sum((label >= 0).astype(jnp.float32))


def _ref_ce(scores, label):
    valid = label >= 0
    lse = jax.scipy.special.logsumexp(scores, axis=-1)
    sel = jnp.take_along_axis(scores, jnp.clip(label, 0)[:, None], axis=1)[:, 0]
    per = lse - sel
    return jnp.sum(jnp.where(valid, per, 0.0)) / jnp.sum(valid.astype(jnp.float32))


if __name__ == "__main__":
    key = jax.random.PRNGKey(0)
    ks = jax.random.split(key, 8)

    A = 704           # anchors (would come from the RPN over a feature map)
    R = 48            # sampled ROIs
    N_CLASS = 21      # 20 fg classes + background

    rpn_loc = jax.random.normal(ks[0], (A, 4), jnp.float32)
    gt_rpn_loc = jax.random.normal(ks[1], (A, 4), jnp.float32)
    gt_rpn_label = jax.random.randint(ks[2], (A,), -1, 2, jnp.int32)  # {-1,0,1}
    rpn_score = jax.random.normal(ks[3], (A, 2), jnp.float32)

    roi_cls_loc = jax.random.normal(ks[4], (R, N_CLASS * 4), jnp.float32)
    gt_roi_loc = jax.random.normal(ks[5], (R, 4), jnp.float32)
    gt_roi_label = jax.random.randint(ks[6], (R,), 0, N_CLASS, jnp.int32)
    roi_score = jax.random.normal(ks[7], (R, N_CLASS), jnp.float32)

    # Small anchor tile so the demo exercises init / accumulate / finalize over
    # several grid steps (A=704 -> 3 steps of 256 lanes).  Use the default
    # anchor_tile=2048 for realistic (~16-20k) anchor counts.
    trainer = FasterRCNNTrainerLosses(rpn_sigma=3.0, roi_sigma=1.0,
                                      anchor_tile=256)
    losses = trainer(rpn_loc, gt_rpn_loc, gt_rpn_label, rpn_score,
                     roi_cls_loc, gt_roi_loc, gt_roi_label, roi_score)
    jax.block_until_ready(losses)

    # reference check (pure JAX, mirrors the PyTorch math)
    ref_rpn_loc = _ref_loc_loss(rpn_loc, gt_rpn_loc, gt_rpn_label, 3.0)
    ref_rpn_cls = _ref_ce(rpn_score, gt_rpn_label)
    roi_loc_ref = jnp.take_along_axis(
        roi_cls_loc.reshape(R, N_CLASS, 4),
        gt_roi_label[:, None, None], axis=1)[:, 0, :]
    ref_roi_loc = _ref_loc_loss(roi_loc_ref, gt_roi_loc, gt_roi_label, 1.0)
    ref_roi_cls = _ref_ce(roi_score, gt_roi_label)

    assert jnp.allclose(losses.rpn_loc_loss, ref_rpn_loc, atol=1e-4, rtol=1e-4)
    assert jnp.allclose(losses.rpn_cls_loss, ref_rpn_cls, atol=1e-4, rtol=1e-4)
    assert jnp.allclose(losses.roi_loc_loss, ref_roi_loc, atol=1e-4, rtol=1e-4)
    assert jnp.allclose(losses.roi_cls_loss, ref_roi_cls, atol=1e-4, rtol=1e-4)
    assert jnp.allclose(
        losses.total_loss,
        ref_rpn_loc + ref_rpn_cls + ref_roi_loc + ref_roi_cls,
        atol=1e-4, rtol=1e-4)
    assert jnp.allclose(losses.total_rpn, ref_rpn_loc + ref_rpn_cls,
                        atol=1e-4, rtol=1e-4)
    assert jnp.allclose(losses.total_roi, ref_roi_loc + ref_roi_cls,
                        atol=1e-4, rtol=1e-4)

    print("KERNEL_OK")
</pallas_src>

<mosaic_0001>
module attributes {stable_mosaic.version = 11 : i64} {
  func.func @_fused_loss_kernel(%arg0: i32, %arg1: memref<11x256xf32, #tpu.memory_space<vmem>>, %arg2: memref<48x8xf32, #tpu.memory_space<vmem>>, %arg3: memref<48x1xi32, #tpu.memory_space<vmem>>, %arg4: memref<48x21xf32, #tpu.memory_space<vmem>>, %arg5: memref<8xf32, #tpu.memory_space<smem>>, %arg6: memref<4x256xf32, #tpu.memory_space<vmem>>, %arg7: memref<1x256xf32, #tpu.memory_space<vmem>>, %arg8: memref<1x256xf32, #tpu.memory_space<vmem>>) attributes {dimension_semantics = [#tpu.dimension_semantics<arbitrary>], iteration_bounds = array<i64: 3>, scalar_prefetch = 0 : i64, scratch_operands = 3 : i64, tpu.core_type = #tpu.core_type<tc>, window_params = [{transform_indices = @transform_0, window_bounds = array<i64: 11, 256>}, {pipeline_mode = #tpu.pipeline_mode<synchronous>, transform_indices = @transform_1, window_bounds = array<i64: 48, 8>}, {pipeline_mode = #tpu.pipeline_mode<synchronous>, transform_indices = @transform_2, window_bounds = array<i64: 48, 1>}, {pipeline_mode = #tpu.pipeline_mode<synchronous>, transform_indices = @transform_3, window_bounds = array<i64: 48, 21>}, {transform_indices = @transform_4, window_bounds = array<i64: 8>}]} {
    %c0_i32 = arith.constant 0 : i32
    %0 = arith.cmpi eq, %arg0, %c0_i32 : i32
    %1 = arith.extui %0 : i1 to i32
    %c0_i32_0 = arith.constant 0 : i32
    %2 = arith.cmpi ne, %1, %c0_i32_0 : i32
    scf.if %2 {
      %cst_25 = arith.constant 0.000000e+00 : f32
      %59 = vector.broadcast %cst_25 : f32 to vector<4x256xf32>
      %c0_26 = arith.constant 0 : index
      %c0_27 = arith.constant 0 : index
      %60 = vector.load %arg6[%c0_26, %c0_27] : memref<4x256xf32, #tpu.memory_space<vmem>>, vector<4x256xf32>
      tpu.vector_store %arg6[%c0_26, %c0_27], %59 {strides = array<i32>} : memref<4x256xf32, #tpu.memory_space<vmem>>, vector<4x256xf32>,
      %cst_28 = arith.constant 0.000000e+00 : f32
      %61 = vector.broadcast %cst_28 : f32 to vector<1x256xf32>
      %c0_29 = arith.constant 0 : index
      %c0_30 = arith.constant 0 : index
      %62 = vector.load %arg7[%c0_29, %c0_30] : memref<1x256xf32, #tpu.memory_space<vmem>>, vector<1x256xf32>
      tpu.vector_store %arg7[%c0_29, %c0_30], %61 {strides = array<i32>} : memref<1x256xf32, #tpu.memory_space<vmem>>, vector<1x256xf32>,
      %cst_31 = arith.constant 0.000000e+00 : f32
      %63 = vector.broadcast %cst_31 : f32 to vector<1x256xf32>
      %c0_32 = arith.constant 0 : index
      %c0_33 = arith.constant 0 : index
      %64 = vector.load %arg8[%c0_32, %c0_33] : memref<1x256xf32, #tpu.memory_space<vmem>>, vector<1x256xf32>
      tpu.vector_store %arg8[%c0_32, %c0_33], %63 {strides = array<i32>} : memref<1x256xf32, #tpu.memory_space<vmem>>, vector<1x256xf32>,
    } else {
    }
    %c0 = arith.constant 0 : index
    %c0_1 = arith.constant 0 : index
    %3 = vector.load %arg1[%c0, %c0_1] : memref<11x256xf32, #tpu.memory_space<vmem>>, vector<4x256xf32>
    %c4 = arith.constant 4 : index
    %c0_2 = arith.constant 0 : index
    %4 = vector.load %arg1[%c4, %c0_2] : memref<11x256xf32, #tpu.memory_space<vmem>>, vector<4x256xf32>
    %c8 = arith.constant 8 : index
    %c0_3 = arith.constant 0 : index
    %5 = vector.load %arg1[%c8, %c0_3] : memref<11x256xf32, #tpu.memory_space<vmem>>, vector<1x256xf32>
    %c9 = arith.constant 9 : index
    %c0_4 = arith.constant 0 : index
    %6 = vector.load %arg1[%c9, %c0_4] : memref<11x256xf32, #tpu.memory_space<vmem>>, vector<1x256xf32>
    %c10 = arith.constant 10 : index
    %c0_5 = arith.constant 0 : index
    %7 = vector.load %arg1[%c10, %c0_5] : memref<11x256xf32, #tpu.memory_space<vmem>>, vector<1x256xf32>
    %cst = arith.constant 5.000000e-01 : f32
    %8 = vector.broadcast %cst : f32 to vector<1x256xf32>
    %9 = arith.cmpf ogt, %5, %8 : vector<1x256xf32>
    %10 = arith.extui %9 : vector<1x256xi1> to vector<1x256xi32>
    %11 = arith.sitofp %10 : vector<1x256xi32> to vector<1x256xf32>
    %cst_6 = arith.constant -5.000000e-01 : f32
    %12 = vector.broadcast %cst_6 : f32 to vector<1x256xf32>
    %13 = arith.cmpf ogt, %5, %12 : vector<1x256xf32>
    %14 = arith.extui %13 : vector<1x256xi1> to vector<1x256xi32>
    %15 = arith.sitofp %14 : vector<1x256xi32> to vector<1x256xf32>
    %16 = arith.subf %3, %4 : vector<4x256xf32>
    %17 = vector.broadcast %11 : vector<1x256xf32> to vector<4x256xf32>
    %18 = arith.mulf %16, %17 : vector<4x256xf32>
    %19 = math.absf %18 : vector<4x256xf32>
    %cst_7 = arith.constant 0.111111112 : f32
    %20 = vector.broadcast %cst_7 : f32 to vector<4x256xf32>
    %21 = arith.cmpf olt, %19, %20 : vector<4x256xf32>
    %22 = arith.extui %21 : vector<4x256xi1> to vector<4x256xi32>
    %23 = arith.sitofp %22 : vector<4x256xi32> to vector<4x256xf32>
    %cst_8 = arith.constant 4.500000e+00 : f32
    %24 = vector.broadcast %cst_8 : f32 to vector<4x256xf32>
    %25 = arith.mulf %23, %24 : vector<4x256xf32>
    %26 = arith.mulf %25, %18 : vector<4x256xf32>
    %27 = arith.mulf %26, %18 : vector<4x256xf32>
    %cst_9 = arith.constant 1.000000e+00 : f32
    %28 = vector.broadcast %cst_9 : f32 to vector<4x256xf32>
    %29 = arith.subf %28, %23 : vector<4x256xf32>
    %cst_10 = arith.constant 0.055555556 : f32
    %30 = vector.broadcast %cst_10 : f32 to vector<4x256xf32>
    %31 = arith.subf %19, %30 : vector<4x256xf32>
    %32 = arith.mulf %29, %31 : vector<4x256xf32>
    %33 = arith.addf %27, %32 : vector<4x256xf32>
    %c0_11 = arith.constant 0 : index
    %c0_12 = arith.constant 0 : index
    %34 = vector.load %arg6[%c0_11, %c0_12] : memref<4x256xf32, #tpu.memory_space<vmem>>, vector<4x256xf32>
    %35 = arith.addf %34, %33 : vector<4x256xf32>
    %c0_13 = arith.constant 0 : index
    %c0_14 = arith.constant 0 : index
    %36 = vector.load %arg6[%c0_13, %c0_14] : memref<4x256xf32, #tpu.memory_space<vmem>>, vector<4x256xf32>
    tpu.vector_store %arg6[%c0_13, %c0_14], %35 {strides = array<i32>} : memref<4x256xf32, #tpu.memory_space<vmem>>, vector<4x256xf32>,
    %37 = arith.maximumf %6, %7 : vector<1x256xf32>
    %38 = arith.subf %6, %37 : vector<1x256xf32>
    %39 = math.exp %38 : vector<1x256xf32>
    %40 = arith.subf %7, %37 : vector<1x256xf32>
    %41 = math.exp %40 : vector<1x256xf32>
    %42 = arith.addf %39, %41 : vector<1x256xf32>
    %43 = math.log %42 : vector<1x256xf32>
    %44 = arith.addf %37, %43 : vector<1x256xf32>
    %cst_15 = arith.constant 5.000000e-01 : f32
    %45 = vector.broadcast %cst_15 : f32 to vector<1x256xf32>
    %46 = arith.cmpf ogt, %5, %45 : vector<1x256xf32>
    %47 = arith.select %46, %7, %6 : vector<1x256xi1>, vector<1x256xf32>
    %c0_16 = arith.constant 0 : index
    %c0_17 = arith.constant 0 : index
    %48 = vector.load %arg7[%c0_16, %c0_17] : memref<1x256xf32, #tpu.memory_space<vmem>>, vector<1x256xf32>
    %49 = arith.subf %44, %47 : vector<1x256xf32>
    %50 = arith.mulf %49, %15 : vector<1x256xf32>
    %51 = arith.addf %48, %50 : vector<1x256xf32>
    %c0_18 = arith.constant 0 : index
    %c0_19 = arith.constant 0 : index
    %52 = vector.load %arg7[%c0_18, %c0_19] : memref<1x256xf32, #tpu.memory_space<vmem>>, vector<1x256xf32>
    tpu.vector_store %arg7[%c0_18, %c0_19], %51 {strides = array<i32>} : memref<1x256xf32, #tpu.memory_space<vmem>>, vector<1x256xf32>,
    %c0_20 = arith.constant 0 : index
    %c0_21 = arith.constant 0 : index
    %53 = vector.load %arg8[%c0_20, %c0_21] : memref<1x256xf32, #tpu.memory_space<vmem>>, vector<1x256xf32>
    %54 = arith.addf %53, %15 : vector<1x256xf32>
    %c0_22 = arith.constant 0 : index
    %c0_23 = arith.constant 0 : index
    %55 = vector.load %arg8[%c0_22, %c0_23] : memref<1x256xf32, #tpu.memory_space<vmem>>, vector<1x256xf32>
    tpu.vector_store %arg8[%c0_22, %c0_23], %54 {strides = array<i32>} : memref<1x256xf32, #tpu.memory_space<vmem>>, vector<1x256xf32>,
    %c2_i32 = arith.constant 2 : i32
    %56 = arith.cmpi eq, %arg0, %c2_i32 : i32
    %57 = arith.extui %56 : i1 to i32
    %c0_i32_24 = arith.constant 0 : i32
    %58 = arith.cmpi ne, %57, %c0_i32_24 : i32
    scf.if %58 {
      %c0_25 = arith.constant 0 : index
      %c0_26 = arith.constant 0 : index
      %59 = vector.load %arg6[%c0_25, %c0_26] : memref<4x256xf32, #tpu.memory_space<vmem>>, vector<4x256xf32>
      %60 = vector.shape_cast %59 : vector<4x256xf32> to vector<1x4x256xf32>
      %cst_27 = arith.constant dense<0.000000e+00> : vector<1xf32>
      %61 = vector.multi_reduction <add>, %60, %cst_27 [1, 2] : vector<1x4x256xf32> to vector<1xf32>
      %62 = vector.shape_cast %61 : vector<1xf32> to vector<1x1x1xf32>
      %63 = vector.extract %62[0, 0, 0] : f32 from vector<1x1x1xf32>
      %c0_28 = arith.constant 0 : index
      %c0_29 = arith.constant 0 : index
      %64 = vector.load %arg7[%c0_28, %c0_29] : memref<1x256xf32, #tpu.memory_space<vmem>>, vector<1x256xf32>
      %65 = vector.shape_cast %64 : vector<1x256xf32> to vector<1x1x256xf32>
      %cst_30 = arith.constant dense<0.000000e+00> : vector<1xf32>
      %66 = vector.multi_reduction <add>, %65, %cst_30 [1, 2] : vector<1x1x256xf32> to vector<1xf32>
      %67 = vector.shape_cast %66 : vector<1xf32> to vector<1x1x1xf32>
      %68 = vector.extract %67[0, 0, 0] : f32 from vector<1x1x1xf32>
      %c0_31 = arith.constant 0 : index
      %c0_32 = arith.constant 0 : index
      %69 = vector.load %arg8[%c0_31, %c0_32] : memref<1x256xf32, #tpu.memory_space<vmem>>, vector<1x256xf32>
      %70 = vector.shape_cast %69 : vector<1x256xf32> to vector<1x1x256xf32>
      %cst_33 = arith.constant dense<0.000000e+00> : vector<1xf32>
      %71 = vector.multi_reduction <add>, %70, %cst_33 [1, 2] : vector<1x1x256xf32> to vector<1xf32>
      %72 = vector.shape_cast %71 : vector<1xf32> to vector<1x1x1xf32>
      %73 = vector.extract %72[0, 0, 0] : f32 from vector<1x1x1xf32>
      %c0_34 = arith.constant 0 : index
      %c0_35 = arith.constant 0 : index
      %74 = vector.load %arg2[%c0_34, %c0_35] : memref<48x8xf32, #tpu.memory_space<vmem>>, vector<48x4xf32>
      %c0_36 = arith.constant 0 : index
      %c4_37 = arith.constant 4 : index
      %75 = vector.load %arg2[%c0_36, %c4_37] : memref<48x8xf32, #tpu.memory_space<vmem>>, vector<48x4xf32>
      %c0_38 = arith.constant 0 : index
      %c0_39 = arith.constant 0 : index
      %76 = vector.load %arg3[%c0_38, %c0_39] : memref<48x1xi32, #tpu.memory_space<vmem>>, vector<48x1xi32>
      %c0_i32_40 = arith.constant 0 : i32
      %77 = vector.broadcast %c0_i32_40 : i32 to vector<48x1xi32>
      %78 = arith.cmpi sgt, %76, %77 : vector<48x1xi32>
      %79 = arith.extui %78 : vector<48x1xi1> to vector<48x1xi32>
      %80 = arith.sitofp %79 : vector<48x1xi32> to vector<48x1xf32>
      %c0_i32_41 = arith.constant 0 : i32
      %81 = vector.broadcast %c0_i32_41 : i32 to vector<48x1xi32>
      %82 = arith.cmpi sge, %76, %81 : vector<48x1xi32>
      %83 = arith.extui %82 : vector<48x1xi1> to vector<48x1xi32>
      %84 = arith.sitofp %83 : vector<48x1xi32> to vector<48x1xf32>
      %85 = arith.subf %74, %75 : vector<48x4xf32>
      %86 = vector.broadcast %80 : vector<48x1xf32> to vector<48x4xf32>
      %87 = arith.mulf %85, %86 : vector<48x4xf32>
      %88 = math.absf %87 : vector<48x4xf32>
      %cst_42 = arith.constant 1.000000e+00 : f32
      %89 = vector.broadcast %cst_42 : f32 to vector<48x4xf32>
      %90 = arith.cmpf olt, %88, %89 : vector<48x4xf32>
      %91 = arith.extui %90 : vector<48x4xi1> to vector<48x4xi32>
      %92 = arith.sitofp %91 : vector<48x4xi32> to vector<48x4xf32>
      %cst_43 = arith.constant 5.000000e-01 : f32
      %93 = vector.broadcast %cst_43 : f32 to vector<48x4xf32>
      %94 = arith.mulf %92, %93 : vector<48x4xf32>
      %95 = arith.mulf %94, %87 : vector<48x4xf32>
      %96 = arith.mulf %95, %87 : vector<48x4xf32>
      %cst_44 = arith.constant 1.000000e+00 : f32
      %97 = vector.broadcast %cst_44 : f32 to vector<48x4xf32>
      %98 = arith.subf %97, %92 : vector<48x4xf32>
      %cst_45 = arith.constant 5.000000e-01 : f32
      %99 = vector.broadcast %cst_45 : f32 to vector<48x4xf32>
      %100 = arith.subf %88, %99 : vector<48x4xf32>
      %101 = arith.mulf %98, %100 : vector<48x4xf32>
      %102 = arith.addf %96, %101 : vector<48x4xf32>
      %103 = vector.shape_cast %102 : vector<48x4xf32> to vector<1x48x4xf32>
      %cst_46 = arith.constant dense<0.000000e+00> : vector<1xf32>
      %104 = vector.multi_reduction <add>, %103, %cst_46 [1, 2] : vector<1x48x4xf32> to vector<1xf32>
      %105 = vector.shape_cast %104 : vector<1xf32> to vector<1x1x1xf32>
      %106 = vector.extract %105[0, 0, 0] : f32 from vector<1x1x1xf32>
      %c0_47 = arith.constant 0 : index
      %c0_48 = arith.constant 0 : index
      %107 = vector.load %arg4[%c0_47, %c0_48] : memref<48x21xf32, #tpu.memory_space<vmem>>, vector<48x21xf32>
      %108 = tpu.iota {dimensions = array<i32: 1>} : vector<48x21xi32>
      %cst_49 = arith.constant dense<0xFF800000> : vector<48xf32>
      %109 = vector.multi_reduction <maximumf>, %107, %cst_49 [1] : vector<48x21xf32> to vector<48xf32>
      %110 = vector.shape_cast %109 : vector<48xf32> to vector<48x1xf32>
      %111 = vector.broadcast %110 : vector<48x1xf32> to vector<48x21xf32>
      %112 = arith.subf %107, %111 : vector<48x21xf32>
      %113 = math.exp %112 : vector<48x21xf32>
      %cst_50 = arith.constant dense<0.000000e+00> : vector<48xf32>
      %114 = vector.multi_reduction <add>, %113, %cst_50 [1] : vector<48x21xf32> to vector<48xf32>
      %115 = vector.shape_cast %114 : vector<48xf32> to vector<48x1xf32>
      %116 = math.log %115 : vector<48x1xf32>
      %117 = arith.addf %110, %116 : vector<48x1xf32>
      %118 = vector.broadcast %76 : vector<48x1xi32> to vector<48x21xi32>
      %119 = arith.cmpi eq, %108, %118 : vector<48x21xi32>
      %cst_51 = arith.constant 0.000000e+00 : f32
      %120 = vector.broadcast %cst_51 : f32 to vector<48x21xf32>
      %121 = arith.select %119, %107, %120 : vector<48x21xi1>, vector<48x21xf32>
      %cst_52 = arith.constant dense<0.000000e+00> : vector<48xf32>
      %122 = vector.multi_reduction <add>, %121, %cst_52 [1] : vector<48x21xf32> to vector<48xf32>
      %123 = vector.shape_cast %122 : vector<48xf32> to vector<48x1xf32>
      %124 = arith.subf %117, %123 : vector<48x1xf32>
      %125 = arith.mulf %124, %84 : vector<48x1xf32>
      %126 = vector.shape_cast %125 : vector<48x1xf32> to vector<1x48x1xf32>
      %cst_53 = arith.constant dense<0.000000e+00> : vector<1xf32>
      %127 = vector.multi_reduction <add>, %126, %cst_53 [1, 2] : vector<1x48x1xf32> to vector<1xf32>
      %128 = vector.shape_cast %127 : vector<1xf32> to vector<1x1x1xf32>
      %129 = vector.extract %128[0, 0, 0] : f32 from vector<1x1x1xf32>
      %130 = vector.shape_cast %84 : vector<48x1xf32> to vector<1x48x1xf32>
      %cst_54 = arith.constant dense<0.000000e+00> : vector<1xf32>
      %131 = vector.multi_reduction <add>, %130, %cst_54 [1, 2] : vector<1x48x1xf32> to vector<1xf32>
      %132 = vector.shape_cast %131 : vector<1xf32> to vector<1x1x1xf32>
      %133 = vector.extract %132[0, 0, 0] : f32 from vector<1x1x1xf32>
      %134 = arith.divf %63, %73 : f32
      %135 = arith.divf %68, %73 : f32
      %136 = arith.divf %106, %133 : f32
      %137 = arith.divf %129, %133 : f32
      %138 = arith.addf %134, %135 : f32
      %139 = arith.addf %136, %137 : f32
      %c0_55 = arith.constant 0 : index
      %140 = memref.load %arg5[%c0_55] : memref<8xf32, #tpu.memory_space<smem>>
      memref.store %134, %arg5[%c0_55] : memref<8xf32, #tpu.memory_space<smem>>
      %c1 = arith.constant 1 : index
      %141 = memref.load %arg5[%c1] : memref<8xf32, #tpu.memory_space<smem>>
      memref.store %135, %arg5[%c1] : memref<8xf32, #tpu.memory_space<smem>>
      %c2 = arith.constant 2 : index
      %142 = memref.load %arg5[%c2] : memref<8xf32, #tpu.memory_space<smem>>
      memref.store %136, %arg5[%c2] : memref<8xf32, #tpu.memory_space<smem>>
      %c3 = arith.constant 3 : index
      %143 = memref.load %arg5[%c3] : memref<8xf32, #tpu.memory_space<smem>>
      memref.store %137, %arg5[%c3] : memref<8xf32, #tpu.memory_space<smem>>
      %144 = arith.addf %138, %139 : f32
      %c4_56 = arith.constant 4 : index
      %145 = memref.load %arg5[%c4_56] : memref<8xf32, #tpu.memory_space<smem>>
      memref.store %144, %arg5[%c4_56] : memref<8xf32, #tpu.memory_space<smem>>
      %c5 = arith.constant 5 : index
      %146 = memref.load %arg5[%c5] : memref<8xf32, #tpu.memory_space<smem>>
      memref.store %138, %arg5[%c5] : memref<8xf32, #tpu.memory_space<smem>>
      %c6 = arith.constant 6 : index
      %147 = memref.load %arg5[%c6] : memref<8xf32, #tpu.memory_space<smem>>
      memref.store %139, %arg5[%c6] : memref<8xf32, #tpu.memory_space<smem>>
      %cst_57 = arith.constant 0.000000e+00 : f32
      %c7 = arith.constant 7 : index
      %148 = memref.load %arg5[%c7] : memref<8xf32, #tpu.memory_space<smem>>
      memref.store %cst_57, %arg5[%c7] : memref<8xf32, #tpu.memory_space<smem>>
    } else {
    }
    return
  }
  func.func @transform_0(%arg0: i32) -> (i32, i32) {
    %c0_i32 = arith.constant 0 : i32
    %c0_i32_0 = arith.constant 0 : i32
    return %c0_i32, %arg0 : i32, i32
  }
  func.func @transform_1(%arg0: i32) -> (i32, i32) {
    %c0_i32 = arith.constant 0 : i32
    %c0_i32_0 = arith.constant 0 : i32
    %c0_i32_1 = arith.constant 0 : i32
    return %c0_i32, %c0_i32_0 : i32, i32
  }
  func.func @transform_2(%arg0: i32) -> (i32, i32) {
    %c0_i32 = arith.constant 0 : i32
    %c0_i32_0 = arith.constant 0 : i32
    %c0_i32_1 = arith.constant 0 : i32
    return %c0_i32, %c0_i32_0 : i32, i32
  }
  func.func @transform_3(%arg0: i32) -> (i32, i32) {
    %c0_i32 = arith.constant 0 : i32
    %c0_i32_0 = arith.constant 0 : i32
    %c0_i32_1 = arith.constant 0 : i32
    return %c0_i32, %c0_i32_0 : i32, i32
  }
  func.func @transform_4(%arg0: i32) -> i32 {
    %c0_i32 = arith.constant 0 : i32
    %c0_i32_0 = arith.constant 0 : i32
    return %c0_i32 : i32
  }
}

</mosaic_0001>

<bundles_post_ra>
// kernel: tpu_custom_call.1
= control target key start
LH: loop header
LB: loop body
LE: loop exit
PB: predicated region body
PF: predicated region fallthrough
CT: control target
= control target key end

     0   :  { %9 = vsyncpa [#allocation7], 0  ;;  %s1076_s15 = smov 0   ;;  %s1078_s16 = smov 0   ;;  %s1451_s0 = inlined_call_operand.vmem [shape: f32[11,768], index: 0, kind: input, shape index: {}]   ;;  %s1452_s1 = inlined_call_operand.vmem [shape: f32[48,8], index: 1, kind: input, shape index: {}]   ;;  %s1453_s2 = inlined_call_operand.vmem [shape: s32[48,1], index: 2, kind: input, shape index: {}]   ;;  %s1454_s3 = inlined_call_operand.vmem [shape: f32[48,21], index: 3, kind: input, shape index: {}]   ;;  %s1455_s4 = inlined_call_operand.hbm [shape: f32[8], index: 4, kind: output, shape index: {}]  }
   0x1   :  { %s1080_s17 = smov 0  }
   0x2 LB: > { %s1092_s18 = sadd.s32 4294967295, %s1042_s17   ;;  %s1095_s19 = sadd.s32 1, %s1042_s17   ;;  %s1042_s17 = sphi %s1080_s17, %s1460_s17   ;;  %s1038_s16 = sphi %s1078_s16, %s1459_s16   ;;  %s1034_s15 = sphi %s1076_s15, %s1458_s15  }
   0x3   : > { %s19_s20 = ssub.s32 %s1042_s17, %s1095_s19  ;;  %s22_s21 = sadd.s32 1, %s1038_s16 }
   0x4   : > { %p20_p0 = scmp.eq.s32.totalorder %s19_s20, 0  ;;  %p29_p1 = scmp.ne.s32.totalorder %s1038_s16, %s1034_s15 }
   0x5   : > { %p30_p2 = scmp.eq.s32.totalorder %s1042_s17, 0  ;;  %p853_p4 = scmp.ge.s32.totalorder %s1042_s17, 3 }
   0x6   : > { %s1104_s22 = scalar_select %p20_p0, %s1038_s16, %s22_s21  }
   0x7   : > { %p31_p3 = por %p30_p2, %p29_p1  ;;  %148 = sbr.rel (%p853_p4) target bundleno = 21 (0x15), region = 28 }
   0xe   : > { %151 = sbr.rel (!%p31_p3) target bundleno = 21 (0x15), region = 32  ;;  %s153_s23 = sand.u32 (%p31_p3), 1, %s1038_s16  }
   0xf   : > { %s898_s24 = sshll.u32 (%p31_p3), %s1042_s17, 4  ;;  %s854_s25 = sshll.u32 (%p31_p3), %s153_s23, 5 }
  0x10   : > { %s158_s28 = scalar_lea.vmem (%p31_p3), %s1451_s0, %s898_s24  ;;  %s155_s29 = scalar_lea.vmem (%p31_p3), [#allocation5], %s854_s25 }
  0x11   : > { %v171_v0 = vld [vmem:[%s158_s28] sm:$0xff] (%p31_p3)  ;;  %v173_v1 = vld [vmem:[%s158_s28 + $0x8] sm:$0xff] (%p31_p3)  ;;  %v175_v2 = vld [vmem:[%s158_s28 + $0x30] sm:$0xff] (%p31_p3) }
  0x12   : > { %172 = vst [vmem:[%s155_s29] sm:$0xff] (%p31_p3), %v171_v0  ;;  %174 = vst [vmem:[%s155_s29 + $0x8] sm:$0xff] (%p31_p3), %v173_v1  ;;  %v177_v3 = vld [vmem:[%s158_s28 + $0x38] sm:$0xff] (%p31_p3) }
  0x13   : > { %176 = vst [vmem:[%s155_s29 + $0x10] sm:$0xff] (%p31_p3), %v175_v2  ;;  %178 = vst [vmem:[%s155_s29 + $0x18] sm:$0xff] (%p31_p3), %v177_v3 }
  0x15 PF: > { %p857_p5 = scmp.ge.s32.totalorder %s1042_s17, 1  ;;  %p183_p6 = scmp.lt.s32.totalorder %s1042_s17, 4 }
  0x17   : > { %p184_p7 = pnand %p857_p5, %p183_p6 }
  0x18   : > { %s190_s30 = sand.u32 (!%p184_p7), 1, %s1034_s15   ;;  %p859_p8 = scmp.ne.s32.totalorder (!%p184_p7), %s1092_s18, 0 }
  0x19   : > { %187 = sbr.rel (%p184_p7) target bundleno = 768 (0x300), region = 55  ;;  %s858_s5 = sshll.u32 (!%p184_p7), %s190_s30, 5 }
  0x1a   : > { %s192_s6 = scalar_lea.vmem (!%p184_p7), [#allocation5], %s858_s5 }
  0x20   : > { %214 = sbr.rel (%p859_p8) target bundleno = 39 (0x27), region = 63  ;;  %v216_v4 = vlaneseq (!%p859_p8)  ;;  %v1044_v5 = vmov (!%p859_p8), 0.0  }
  0x21   : > { %215 = vst [vmem:[#allocation2] sm:$0xff] (!%p859_p8), %v1044_v5 }
  0x22   : > { %vm218_vm0 = vcmp.lt.s32.totalorder (!%p859_p8), %v216_v4, 256 }
  0x23   : > { %220 = vst.msk [vmem:[#allocation3] sm:$0x3] (!%p859_p8), %vm218_vm0, %v1044_v5  ;;  %221 = vst.msk [vmem:[#allocation4] sm:$0x3] (!%p859_p8), %vm218_vm0, %v1044_v5 }
  0x27 PF: > { %v222_v6 = vld [vmem:[%s192_s6] sm:$0xf]  ;;  %v223_v7 = vld [vmem:[%s192_s6 + $0x8] sm:$0xf]  ;;  %v224_v8 = vld [vmem:[%s192_s6] sm:$0xf0]  ;;  %v247_v9 = vlaneseq }
  0x28   : > { %v225_v10 = vld [vmem:[%s192_s6 + $0x8] sm:$0xf0]  ;;  %v860_v11 = vld [vmem:[%s192_s6 + $0x10] ss:$8 sm:$0x3]  ;;  %v240_v12 = vrot.slane %v224_v8, 4 }
  0x29   : > { %vm232_vm1 = vcmp.gt.f32.partialorder %v860_v11, 0.5  ;;  %v241_v13 = vrot.slane %v225_v10, 4  ;;  %v248_v14 = vshrl.u32 %v247_v9, 7  ;;  %v1045_v15 = vmov 0.0   ;;  %v281_v55 = vld [vmem:[#allocation2] sm:$0xff]  ;;  %p869_p9 = scmp.ne.s32.totalorder %s1092_s18, 2 }
  0x2a   : > { %v863_v16 = vsel %vm232_vm1, 1.0, %v1045_v15  ;;  %v861_v17 = vld [vmem:[%s192_s6 + $0x11] ss:$8 sm:$0x3]  ;;  %vm235_vm2 = vcmp.gt.f32.partialorder %v860_v11, -0.5  ;;  %v244_v18 = vsub.f32 %v222_v6, %v240_v12  ;;  %vm1123_vm3 = vcmp.lt.s32.totalorder %v247_v9, 256 }
  0x2b   : > { %v245_v19 = vsub.f32 %v223_v7, %v241_v13  ;;  %v1118_v20 = vsub.s32 0, %v248_v14  ;;  %v1120_v21 = vsub.s32 1, %v248_v14  ;;  %v862_v22 = vld [vmem:[%s192_s6 + $0x12] ss:$8 sm:$0x3]  ;;  %v864_v23 = vsel %vm235_vm2, 1.0, %v1045_v15 }
  0x2c   : > { %v288_v24 = vmax.f32 %v861_v17, %v862_v22  ;;  %v309_v26 = vld [vmem:[#allocation4] sm:$0x3]  ;;  %v299_v62 = vsel %vm232_vm1, %v862_v22, %v861_v17  ;;  %v300_v1 = vld [vmem:[#allocation3] sm:$0x3]  ;;  %v1138_v4 = vld [vmem:[%s1454_s3] sm:$0xff] (!%p869_p9)  ;;  %vm591_vm6 = vcmask (!%p869_p9), 171008  }
  0x2d   : > { %v250_v27 = vrot.slane %v863_v16, %v1118_v20  ;;  %v254_v28 = vrot.slane %v863_v16, %v1120_v21  ;;  %v310_v29 = vadd.f32 %v864_v23, %v309_v26  ;;  %v1143_v5 = vld [vmem:[%s1454_s3 + $0x10] sm:$0xff] (!%p869_p9)  ;;  %v1148_v6 = vld [vmem:[%s1454_s3 + $0x8] sm:$0xff] (!%p869_p9)  ;;  %v592_v7 = vsel (!%p869_p9), %vm591_vm6, %v1138_v4, -inf  ;;  %v1157_v10 = vld [vmem:[%s1454_s3 + $0x18] sm:$0xff] (!%p869_p9)  ;;  %s1048_s13 = smov (!%p869_p9), 124   ;;  %s1049_s29 = smov (!%p869_p9), 0.0  }
  0x2e   : > { %v289_v30 = vsub.f32 %v861_v17, %v288_v24  ;;  %v292_v31 = vsub.f32 %v862_v22, %v288_v24  ;;  %v598_v8 = vsel (!%p869_p9), %vm591_vm6, %v1143_v5, -inf  ;;  %v1046_v11 = vmov (!%p869_p9), 0   ;;  %593 = vmax.xlane.f32.xlu0 (!%p869_p9), %v592_v7  ;;  %v1166_v14 = vld [vmem:[%s1454_s3 + $0x20] sm:$0xff] (!%p869_p9)  ;;  %v1193_v22 = vld [vmem:[%s1453_s2 + $0x10] sm:$0xff] (!%p869_p9)  ;;  %799 = sst [smem:[#allocation6 + $0x7]] (!%p869_p9), %s1049_s29 }
  0x2f   : > { %v257_v32 = vmul.f32 %v250_v27, %v244_v18  ;;  %v258_v33 = vmul.f32 %v254_v28, %v245_v19  ;;  %311 = vst.msk [vmem:[#allocation4] sm:$0x3] %vm1123_vm3, %v310_v29  ;;  %959 = vset.pattern.permute.xlu1 (!%p869_p9), %v1046_v11  ;;  %958 = vset.pattern.permute.xlu0 (!%p869_p9), %v1046_v11  ;;  %v595_v12 = vsel (!%p869_p9), %vm591_vm6, %v1148_v6, -inf  ;;  %v601_v13 = vsel (!%p869_p9), %vm591_vm6, %v1157_v10, -inf  ;;  %v1180_v18 = vld [vmem:[%s1453_s2] sm:$0xff] (!%p869_p9)  ;;  %v1185_v19 = vld [vmem:[%s1453_s2 + $0x8] sm:$0xff] (!%p869_p9) }
  0x30   : > { %v290_v34 = vmul.f32 1.442695, %v289_v30  ;;  %v293_v35 = vmul.f32 1.442695, %v292_v31  ;;  %599 = vmax.xlane.f32.xlu1 (!%p869_p9), %v598_v8  ;;  %v604_v16 = vsel (!%p869_p9), %vm591_vm6, %v1166_v14, -inf  ;;  %vm395_vm7 = vcmp.gt.s32.totalorder (!%p869_p9), %v1185_v19, 0 }
  0x31   : > { %v259_v36 = vand.u32 2147483647, %v257_v32  ;;  %v260_v37 = vand.u32 2147483647, %v258_v33  ;;  %vm394_vm8 = vcmp.gt.s32.totalorder (!%p869_p9), %v1180_v18, 0  ;;  %v1202_v27 = vld [vmem:[%s1453_s2 + $0x18] sm:$0xff] (!%p869_p9) }
  0x32   : > { %952 = vpow2.f32 %v290_v34  ;;  %596 = vmax.xlane.f32.xlu0 (!%p869_p9), %v595_v12  ;;  %v1208_v28 = vld [vmem:[%s1453_s2 + $0x20] sm:$0xff] (!%p869_p9)  ;;  %vm396_vm9 = vcmp.gt.s32.totalorder (!%p869_p9), %v1193_v22, 0  ;;  %vm397_vm10 = vcmp.gt.s32.totalorder (!%p869_p9), %v1202_v27, 0  ;;  %v1216_v29 = vld [vmem:[%s1453_s2 + $0x28] sm:$0xff] (!%p869_p9)  ;;  %v1278_v7 = vld [vmem:[%s1452_s1 + $0x10] sm:$0xff] (!%p869_p9) }
  0x33   : > { %vm261_vm4 = vcmp.lt.f32.partialorder %v259_v36, 0.11111111  ;;  %vm262_vm5 = vcmp.lt.f32.partialorder %v260_v37, 0.11111111  ;;  %v867_v38 = vadd.f32 -0.055555556, %v259_v36  ;;  %954 = vpow2.f32 %v293_v35 }
  0x34   : > { %v865_v39 = vsel %vm261_vm4, 1.0, %v1045_v15  ;;  %v866_v40 = vsel %vm262_vm5, 1.0, %v1045_v15  ;;  %v868_v41 = vadd.f32 -0.055555556, %v260_v37  ;;  %v1171_v15 = vld [vmem:[%s1454_s3 + $0x28] sm:$0xff] (!%p869_p9)  ;;  %602 = vmax.xlane.f32.xlu1 (!%p869_p9), %v601_v13  ;;  %vm398_vm11 = vcmp.gt.s32.totalorder (!%p869_p9), %v1208_v28, 0 }
  0x35   : > { %v267_v42 = vmul.f32 4.5, %v865_v39  ;;  %v268_v43 = vmul.f32 4.5, %v866_v40  ;;  %v273_v44 = vsub.f32 1.0, %v865_v39  ;;  %v274_v45 = vsub.f32 1.0, %v866_v40 }
  0x36   : > { %v607_v17 = vsel (!%p869_p9), %vm591_vm6, %v1171_v15, -inf  ;;  %605 = vmax.xlane.f32.xlu0 (!%p869_p9), %v604_v16  ;;  %vm399_vm12 = vcmp.gt.s32.totalorder (!%p869_p9), %v1216_v29, 0  ;;  %vm413_vm4 = vcmp.ge.s32.totalorder (!%p869_p9), %v1185_v19, 0  ;;  %vm412_vm5 = vcmp.ge.s32.totalorder (!%p869_p9), %v1180_v18, 0 }
  0x37   : > { %v269_v46 = vmul.f32 %v267_v42, %v257_v32  ;;  %v270_v47 = vmul.f32 %v268_v43, %v258_v33  ;;  %v277_v48 = vmul.f32 %v867_v38, %v273_v44  ;;  %v278_v49 = vmul.f32 %v868_v41, %v274_v45 }
  0x38   : > { %608 = vmax.xlane.f32.xlu1 (!%p869_p9), %v607_v17 }
  0x39   : > { %v271_v50 = vmul.f32 %v269_v46, %v257_v32  ;;  %v272_v51 = vmul.f32 %v270_v47, %v258_v33 }
  0x3b   : > { %v279_v52 = vadd.f32 %v277_v48, %v271_v50  ;;  %v280_v53 = vadd.f32 %v278_v49, %v272_v51  ;;  %v1248_v50 = vand.u32 (!%p869_p9), 127, %v247_v9 }
  0x3c   : > { %v953_v54 = vpop.eup %952 }
  0x3d   : > { %v955_v56 = vpop.eup %954  ;;  %v284_v57 = vcombine.low %v279_v52, %v280_v53 }
  0x3e   : > { %v295_v58 = vadd.f32 %v955_v56, %v953_v54 }
  0x3f   : > { %v286_v59 = vadd.f32 %v284_v57, %v281_v55 }
  0x40   : > { %956 = vlog2.f32 %v295_v58 }
  0x41   : > { %287 = vst [vmem:[#allocation2] sm:$0xff] %v286_v59 }
  0x49   : > { %668 = vperm.xlu1 (!%p869_p9), %959, %v1185_v19  }
  0x4a   : > { %v957_v60 = vpop.eup %956 }
  0x4b   : > { %v297_v61 = vmul.f32 0.6931472, %v957_v60 }
  0x4c   : > { %665 = vperm.xlu0 (!%p869_p9), %958, %v1180_v18  }
  0x4d   : > { %v298_v63 = vadd.f32 %v297_v61, %v288_v24  ;;  %671 = vperm.xlu1 (!%p869_p9), %959, %v1193_v22  }
  0x4f   : > { %v301_v0 = vsub.f32 %v298_v63, %v299_v62  ;;  %315 = sbr.rel (%p869_p9) target bundleno = 753 (0x2f1), region = 67 }
  0x51   : > { %v302_v2 = vmul.f32 %v864_v23, %v301_v0  ;;  %v1047_v23 = vmov (!%p869_p9), 0.0   ;;  %674 = vperm.xlu1 (!%p869_p9), %959, %v1202_v27  }
  0x52   : > { %v870_v24 = vsel (!%p869_p9), %vm394_vm8, 1.0, %v1047_v23  ;;  %v871_v25 = vsel (!%p869_p9), %vm395_vm7, 1.0, %v1047_v23  ;;  %v872_v30 = vsel (!%p869_p9), %vm396_vm9, 1.0, %v1047_v23  ;;  %v873_v31 = vsel (!%p869_p9), %vm397_vm10, 1.0, %v1047_v23 }
  0x53   : > { %v303_v3 = vadd.f32 %v302_v2, %v300_v1  ;;  %v960_v26 = vpack.i.bf16 (!%p869_p9), %v871_v25, %v870_v24  ;;  %v965_v32 = vpack.i.bf16 (!%p869_p9), %v873_v31, %v872_v30  ;;  %v874_v33 = vsel (!%p869_p9), %vm398_vm11, 1.0, %v1047_v23 }
  0x54   : > { %v875_v34 = vsel (!%p869_p9), %vm399_vm12, 1.0, %v1047_v23  ;;  %vm320_vm7 = vcmask (!%p869_p9), 1043456   ;;  %vm724_vm8 = vcmask (!%p869_p9), 7168   ;;  %vm414_vm9 = vcmp.ge.s32.totalorder (!%p869_p9), %v1193_v22, 0 }
  0x55   : > { %308 = vst.msk [vmem:[#allocation3] sm:$0x3] %vm1123_vm3, %v303_v3  ;;  %961 = vperm.xlu0 (!%p869_p9), %958, %v960_v26   ;;  %677 = vperm.xlu1 (!%p869_p9), %959, %v1208_v28   ;;  %v970_v35 = vpack.i.bf16 (!%p869_p9), %v875_v34, %v874_v33  ;;  %vm345_vm3 = vcmask (!%p869_p9), 1040384   ;;  %vm415_vm10 = vcmp.ge.s32.totalorder (!%p869_p9), %v1202_v27, 0  ;;  %vm417_vm11 = vcmp.ge.s32.totalorder (!%p869_p9), %v1216_v29, 0 }
  0x59   : > { %680 = vperm.xlu1 %959, %v1216_v29  }
  0x5c   : > { %v333_v34 = vld [vmem:[#allocation3] sm:$0x3] }
  0x5d   : > { %966 = vperm.xlu1 %959, %v965_v32  }
  0xbb   : > { %v1225_v36 = vpop.xlane.xlu0 %593 }
  0xbc   : > { %v610_v38 = vsub.f32 %v1138_v4, %v1225_v36 }
  0xbd   : > { %v1227_v37 = vpop.xlane.xlu1 %599 }
  0xbe   : > { %v612_v39 = vsub.f32 %v1143_v5, %v1227_v37  ;;  %v616_v43 = vmul.f32 1.442695, %v610_v38 }
  0xbf   : > { %v1233_v40 = vpop.xlane.xlu0 %596 }
  0xc0   : > { %v611_v42 = vsub.f32 %v1148_v6, %v1233_v40  ;;  %v620_v45 = vmul.f32 1.442695, %v612_v39  ;;  %v338_v39 = vrot.slane %v333_v34, %v1118_v20 }
  0xc1   : > { %v1235_v41 = vpop.xlane.xlu1 %602 }
  0xc2   : > { %v618_v44 = vmul.f32 1.442695, %v611_v42  ;;  %v613_v46 = vsub.f32 %v1157_v10, %v1235_v41  ;;  %v342_v42 = vrot.slane %v333_v34, %v1120_v21 }
  0xc3   : > { %v1241_v47 = vpop.xlane.xlu0 %605 }
  0xc4   : > { %976 = vpow2.f32 %v618_v44  ;;  %v614_v49 = vsub.f32 %v1166_v14, %v1241_v47  ;;  %v622_v52 = vmul.f32 1.442695, %v613_v46  ;;  %v346_v46 = vsel %vm345_vm3, %v338_v39, 0.0 }
  0xc5   : > { %v1243_v48 = vpop.xlane.xlu1 %608  ;;  %978 = vpow2.f32 %v616_v43  ;;  %v358_v43 = vld [vmem:[#allocation4] sm:$0x3] }
  0xc6   : > { %v624_v51 = vmul.f32 1.442695, %v614_v49  ;;  %980 = vpow2.f32 %v620_v45  ;;  %v615_v8 = vsub.f32 %v1171_v15, %v1243_v48  ;;  %v347_v49 = vsel %vm345_vm3, %v342_v42, 0.0 }
  0xc8   : > { %982 = vpow2.f32 %v624_v51  ;;  %v626_v11 = vmul.f32 1.442695, %v615_v8  ;;  %v367_v51 = vrot.slane %v358_v43, %v1120_v21 }
  0xc9   : > { %v669_v53 = vpop.permute.xlu1 %668  ;;  %984 = vpow2.f32 %v622_v52  ;;  %v877_v52 = vsel %vm413_vm4, 1.0, %v1047_v23 }
  0xca   : > { %vm683_vm13 = vcmp.eq.s32.totalorder %v1248_v50, %v669_v53  ;;  %986 = vpow2.f32 %v626_v11  ;;  %v876_v53 = vsel %vm412_vm5, 1.0, %v1047_v23  ;;  %v746_v18 = vsel %vm724_vm8, %v877_v52, 0.0 }
  0xcb   : > { %v689_v54 = vsel %vm683_vm13, %v1148_v6, 0.0  ;;  %v666_v56 = vpop.permute.xlu0 %665  ;;  %v1269_v6 = vld [vmem:[%s1452_s1 + $0x8] sm:$0xff]  ;;  %v371_v21 = vsel %vm345_vm3, %v367_v51, 0.0 }
  0xcc   : > { %v697_v55 = vsel %vm591_vm6, %v689_v54, 0.0  ;;  %vm682_vm14 = vcmp.eq.s32.totalorder %v1248_v50, %v666_v56  ;;  %v348_v56 = vadd.f32 %v347_v49, %v346_v46 }
  0xcd   : > { %698 = vadd.xlane.f32.xlu0 %v697_v55  ;;  %v688_v9 = vsel %vm682_vm14, %v1138_v4, 0.0  ;;  %v1264_v4 = vld [vmem:[%s1452_s1] sm:$0xff]  ;;  %v672_v12 = vpop.permute.xlu1 %671  ;;  %v745_v55 = vsel %vm724_vm8, %v876_v53, 0.0 }
  0xce   : > { %v977_v57 = vpop.eup %976  ;;  %v694_v58 = vsel %vm591_vm6, %v688_v9, 0.0  ;;  %vm684_vm0 = vcmp.eq.s32.totalorder %v1248_v50, %v672_v12 }
  0xcf   : > { %v979_v59 = vpop.eup %978  ;;  %695 = vadd.xlane.f32.xlu1 %v694_v58  ;;  %v631_v60 = vsel %vm591_vm6, %v977_v57, 0.0  ;;  %v690_v30 = vsel %vm684_vm0, %v1143_v5, 0.0  ;;  %v1304_v5 = vld [vmem:[%s1452_s1 + $0x20] sm:$0xff]  ;;  %v747_v57 = vadd.f32 %v746_v18, %v745_v55  ;;  %v1334_v58 = vsel %vm414_vm9, 1.0, %v1047_v23 }
  0xd0   : > { %v981_v61 = vpop.eup %980  ;;  %v628_v63 = vsel %vm591_vm6, %v979_v59, 0.0  ;;  %v700_v32 = vsel %vm591_vm6, %v690_v30, 0.0  ;;  %v748_v59 = vsel %vm724_vm8, %v1334_v58, 0.0  ;;  %vm562_vm0 = vcmask 31744  }
  0xd1   : > { %632 = vadd.xlane.f32.xlu0 %v631_v60  ;;  %v634_v1 = vsel %vm591_vm6, %v981_v61, 0.0  ;;  %v675_v13 = vpop.permute.xlu1 %674  ;;  %v1340_v60 = vsel %vm415_vm10, 1.0, %v1047_v23  ;;  %v749_v61 = vadd.f32 %v748_v59, %v747_v57 }
  0xd2   : > { %v983_v62 = vpop.eup %982  ;;  %vm685_vm15 = vcmp.eq.s32.totalorder %v1248_v50, %v675_v13 }
  0xd3   : > { %629 = vadd.xlane.f32.xlu1 %v628_v63  ;;  %v640_v0 = vsel %vm591_vm6, %v983_v62, 0.0  ;;  %v985_v2 = vpop.eup %984  ;;  %v691_v24 = vsel %vm685_vm15, %v1157_v10, 0.0  ;;  %v1297_v10 = vld [vmem:[%s1452_s1 + $0x18] sm:$0xff]  ;;  %v750_v62 = vsel %vm724_vm8, %v1340_v60, 0.0  ;;  %v1350_v63 = vsel %vm417_vm11, 1.0, %v1047_v23 }
  0xd4   : > { %v637_v3 = vsel %vm591_vm6, %v985_v2, 0.0  ;;  %v987_v16 = vpop.eup %986  ;;  %v703_v26 = vsel %vm591_vm6, %v691_v24, 0.0 }
  0xd5   : > { %641 = vadd.xlane.f32.xlu0 %v640_v0  ;;  %v678_v17 = vpop.permute.xlu1 %677  ;;  %v643_v25 = vsel %vm591_vm6, %v987_v16, 0.0  ;;  %v751_v0 = vadd.f32 %v750_v62, %v749_v61 }
  0xd6   : > { %vm686_vm1 = vcmp.eq.s32.totalorder %v1248_v50, %v678_v17 }
  0xd7   : > { %635 = vadd.xlane.f32.xlu1 %v634_v1  ;;  %v692_v31 = vsel %vm686_vm1, %v1166_v14, 0.0  ;;  %v1311_v14 = vld [vmem:[%s1452_s1 + $0x28] sm:$0xff]  ;;  %v962_v1 = vpop.permute.xlu0 %961 }
  0xd8   : > { %v706_v33 = vsel %vm591_vm6, %v692_v31, 0.0 }
  0xd9   : > { %v681_v38 = vpop.permute.xlu1 %680 }
  0xda   : > { %vm687_vm2 = vcmp.eq.s32.totalorder %v1248_v50, %v681_v38  ;;  %v363_v50 = vrot.slane %v358_v43, %v1118_v20 }
  0xdb   : > { %638 = vadd.xlane.f32.xlu1 %v637_v3  ;;  %v693_v45 = vsel %vm687_vm2, %v1171_v15, 0.0 }
  0xdc   : > { %v709_v15 = vsel %vm591_vm6, %v693_v45, 0.0  ;;  %v370_v20 = vsel %vm345_vm3, %v363_v50, 0.0  ;;  %vm416_vm6 = vcmp.ge.s32.totalorder %v1208_v28, 0  ;;  %v754_v28 = vsel %vm724_vm8, %v1350_v63, 0.0 }
  0xdd   : > { %v372_v22 = vadd.f32 %v371_v21, %v370_v20  ;;  %v1347_v27 = vsel %vm416_vm6, 1.0, %v1047_v23  ;;  %v1356_v8 = vpop.permute.xlu1 %966  ;;  %v964_v50 = vunpack.i.h.bf16 %v962_v1 }
  0xde   : > { %v752_v2 = vsel %vm724_vm8, %v1347_v27, 0.0  ;;  %v968_v18 = vunpack.i.l.bf16 %v1356_v8 }
  0xdf   : > { %v753_v3 = vadd.f32 %v752_v2, %v751_v0 }
  0xe1   : > { %v755_v29 = vadd.f32 %v754_v28, %v753_v3 }
  0xeb   : > { %436 = vrot.lane.b32.xlu0 %v1264_v4, %s1048_s13 }
  0xec   : > { %438 = vrot.lane.b32.xlu1 %v1269_v6, %s1048_s13 }
  0xef   : > { %971 = vperm.xlu0 %958, %v970_v35   ;;  %v316_v35 = vld [vmem:[#allocation2] sm:$0xff] }
  0xf0   : > { %v318_v44 = vcombine.high %v316_v35, %v316_v35  ;;  %v321_v54 = vsel %vm320_vm7, %v316_v35, 0.0 }
  0xf2   : > { %v322_v19 = vsel %vm320_vm7, %v318_v44, 0.0 }
  0xf3   : > { %440 = vrot.lane.b32.xlu0 %v1278_v7, %s1048_s13  ;;  %v323_v9 = vadd.f32 %v322_v19, %v321_v54  ;;  %v963_v54 = vunpack.i.l.bf16 %v962_v1 }
 0x110   : > { %644 = vadd.xlane.f32.xlu1 %v643_v25 }
 0x112   : > { %704 = vadd.xlane.f32.xlu0 %v703_v26 }
 0x114   : > { %701 = vadd.xlane.f32.xlu1 %v700_v32 }
 0x116   : > { %707 = vadd.xlane.f32.xlu0 %v706_v33 }
 0x125   : > { %442 = vrot.lane.b32.xlu1 %v1297_v10, %s1048_s13 }
 0x12c   : > { %444 = vrot.lane.b32.xlu0 %v1304_v5, %s1048_s13 }
 0x130   : > { %446 = vrot.lane.b32.xlu0 %v1311_v14, %s1048_s13 }
 0x149   : > { %710 = vadd.xlane.f32.xlu1 %v709_v15 }
 0x14d   : > { %349 = vadd.xlane.f32.xlu1 %v348_v56 }
 0x14f   : > { %324 = vadd.xlane.f32.xlu0 %v323_v9 }
 0x151   : > { %373 = vadd.xlane.f32.xlu1 %v372_v22 }
 0x153   : > { %756 = vadd.xlane.f32.xlu0 %v755_v29 }
 0x15a   : > { %v699_v11 = vpop.xlane.xlu0 %698 }
 0x15c   : > { %v696_v12 = vpop.xlane.xlu1 %695 }
 0x15e   : > { %v633_v13 = vpop.xlane.xlu0 %632 }
 0x15f   : > { %988 = vlog2.f32 %v633_v13 }
 0x160   : > { %v630_v16 = vpop.xlane.xlu1 %629 }
 0x161   : > { %990 = vlog2.f32 %v630_v16 }
 0x162   : > { %v1366_v44 = vpop.xlane.xlu0 %641 }
 0x164   : > { %v1364_v43 = vpop.xlane.xlu1 %635 }
 0x165   : > { %992 = vlog2.f32 %v1364_v43 }
 0x168   : > { %v1368_v45 = vpop.xlane.xlu1 %638 }
 0x169   : > { %v989_v17 = vpop.eup %988  ;;  %994 = vlog2.f32 %v1368_v45 }
 0x16a   : > { %v649_v24 = vmul.f32 0.6931472, %v989_v17  ;;  %996 = vlog2.f32 %v1366_v44 }
 0x16b   : > { %v991_v25 = vpop.eup %990 }
 0x16c   : > { %v659_v26 = vadd.f32 %v649_v24, %v1233_v40  ;;  %v647_v30 = vmul.f32 0.6931472, %v991_v25  ;;  %v437_v40 = vpop.permute.xlu0 %436  ;;  %v439_v49 = vpop.permute.xlu1 %438 }
 0x16e   : > { %v713_v31 = vsub.f32 %v659_v26, %v699_v11  ;;  %v658_v32 = vadd.f32 %v647_v30, %v1225_v36  ;;  %v455_v36 = vsub.f32 %v1269_v6, %v439_v49 }
 0x16f   : > { %v993_v43 = vpop.eup %992 }
 0x170   : > { %v712_v33 = vsub.f32 %v658_v32, %v696_v12  ;;  %v719_v34 = vmul.f32 %v877_v52, %v713_v31  ;;  %v1370_v46 = vpop.permute.xlu0 %971  ;;  %v454_v52 = vsub.f32 %v1264_v4, %v437_v40  ;;  %v969_v12 = vunpack.i.h.bf16 %v1356_v8 }
 0x171   : > { %v973_v26 = vunpack.i.l.bf16 %v1370_v46 }
 0x172   : > { %v718_v35 = vmul.f32 %v876_v53, %v712_v33  ;;  %v726_v39 = vsel %vm724_vm8, %v719_v34, 0.0  ;;  %v491_v53 = vmul.f32 %v964_v50, %v455_v36  ;;  %v490_v55 = vmul.f32 %v963_v54, %v454_v52 }
 0x173   : > { %v974_v50 = vunpack.i.h.bf16 %v1370_v46 }
 0x174   : > { %v725_v38 = vsel %vm724_vm8, %v718_v35, 0.0  ;;  %v441_v51 = vpop.permute.xlu0 %440  ;;  %v497_v15 = vand.u32 2147483647, %v491_v53  ;;  %v496_v20 = vand.u32 2147483647, %v490_v55 }
 0x175   : > { %v1362_v42 = vadd.f32 %v726_v39, %v725_v38  ;;  %v456_v19 = vsub.f32 %v1278_v7, %v441_v51 }
 0x176   : > { %vm503_vm12 = vcmp.lt.f32.partialorder %v497_v15, 1.0  ;;  %vm502_vm13 = vcmp.lt.f32.partialorder %v496_v20, 1.0  ;;  %v889_v29 = vadd.f32 -0.5, %v497_v15  ;;  %v888_v32 = vadd.f32 -0.5, %v496_v20 }
 0x177   : > { %v492_v56 = vmul.f32 %v968_v18, %v456_v19  ;;  %v883_v9 = vsel %vm503_vm12, 1.0, %v1047_v23  ;;  %v882_v6 = vsel %vm502_vm13, 1.0, %v1047_v23 }
 0x178   : > { %v521_v57 = vmul.f32 0.5, %v883_v9  ;;  %v520_v22 = vmul.f32 0.5, %v882_v6  ;;  %v539_v2 = vsub.f32 1.0, %v883_v9  ;;  %v538_v13 = vsub.f32 1.0, %v882_v6 }
 0x179   : > { %v498_v21 = vand.u32 2147483647, %v492_v56 }
 0x17a   : > { %v527_v61 = vmul.f32 %v521_v57, %v491_v53  ;;  %v526_v3 = vmul.f32 %v520_v22, %v490_v55  ;;  %v551_v25 = vmul.f32 %v889_v29, %v539_v2  ;;  %v550_v39 = vmul.f32 %v888_v32, %v538_v13 }
 0x17b   : > { %vm504_vm14 = vcmp.lt.f32.partialorder %v498_v21, 1.0  ;;  %v890_v49 = vadd.f32 -0.5, %v498_v21 }
 0x17c   : > { %v884_v7 = vsel %vm504_vm14, 1.0, %v1047_v23  ;;  %v533_v28 = vmul.f32 %v527_v61, %v491_v53  ;;  %v532_v31 = vmul.f32 %v526_v3, %v490_v55 }
 0x17d   : > { %v522_v0 = vmul.f32 0.5, %v884_v7  ;;  %v540_v33 = vsub.f32 1.0, %v884_v7 }
 0x17e   : > { %v557_v35 = vadd.f32 %v551_v25, %v533_v28  ;;  %v556_v52 = vadd.f32 %v550_v39, %v532_v31  ;;  %v651_v39 = vmul.f32 0.6931472, %v993_v43 }
 0x17f   : > { %v528_v16 = vmul.f32 %v522_v0, %v492_v56  ;;  %v552_v53 = vmul.f32 %v890_v49, %v540_v33 }
 0x180   : > { %v564_v19 = vsel %vm562_vm0, %v557_v35, 0.0  ;;  %v563_v6 = vsel %vm562_vm0, %v556_v52, 0.0  ;;  %v660_v49 = vadd.f32 %v651_v39, %v1227_v37 }
 0x181   : > { %v534_v40 = vmul.f32 %v528_v16, %v492_v56  ;;  %v565_v22 = vadd.f32 %v564_v19, %v563_v6 }
 0x183   : > { %v558_v18 = vadd.f32 %v552_v53, %v534_v40  ;;  %v995_v40 = vpop.eup %994 }
 0x185   : > { %v566_v3 = vsel %vm562_vm0, %v558_v18, 0.0 }
 0x186   : > { %v567_v25 = vadd.f32 %v566_v3, %v565_v22 }
 0x19d   : > { %v1378_v4 = vpop.xlane.xlu1 %644 }
 0x19e   : > { %998 = vlog2.f32 %v1378_v4 }
 0x19f   : > { %v1380_v59 = vpop.xlane.xlu0 %704 }
 0x1a1   : > { %v1383_v62 = vpop.xlane.xlu1 %701 }
 0x1a3   : > { %v1385_v1 = vpop.xlane.xlu0 %707 }
 0x1a5   : > { %v443_v11 = vpop.permute.xlu1 %442 }
 0x1a6   : > { %v457_v17 = vsub.f32 %v1297_v10, %v443_v11 }
 0x1a7   : > { %v445_v24 = vpop.permute.xlu0 %444 }
 0x1a8   : > { %v458_v30 = vsub.f32 %v1304_v5, %v445_v24  ;;  %v493_v34 = vmul.f32 %v969_v12, %v457_v17 }
 0x1aa   : > { %v494_v38 = vmul.f32 %v973_v26, %v458_v30  ;;  %v499_v8 = vand.u32 2147483647, %v493_v34 }
 0x1ab   : > { %v447_v36 = vpop.permute.xlu0 %446 }
 0x1ac   : > { %v500_v10 = vand.u32 2147483647, %v494_v38  ;;  %v459_v51 = vsub.f32 %v1311_v14, %v447_v36  ;;  %vm505_vm15 = vcmp.lt.f32.partialorder %v499_v8, 1.0  ;;  %v891_v14 = vadd.f32 -0.5, %v499_v8 }
 0x1ad   : > { %v885_v5 = vsel %vm505_vm15, 1.0, %v1047_v23  ;;  %v653_v8 = vmul.f32 0.6931472, %v995_v40  ;;  %v714_v36 = vsub.f32 %v660_v49, %v1383_v62 }
 0x1ae   : > { %vm506_vm1 = vcmp.lt.f32.partialorder %v500_v10, 1.0  ;;  %v495_v54 = vmul.f32 %v974_v50, %v459_v51  ;;  %v523_v55 = vmul.f32 0.5, %v885_v5  ;;  %v541_v15 = vsub.f32 1.0, %v885_v5  ;;  %v997_v50 = vpop.eup %996 }
 0x1af   : > { %v886_v56 = vsel %vm506_vm1, 1.0, %v1047_v23  ;;  %v892_v7 = vadd.f32 -0.5, %v500_v10  ;;  %v655_v10 = vmul.f32 0.6931472, %v997_v50  ;;  %v661_v45 = vadd.f32 %v653_v8, %v1235_v41  ;;  %v999_v53 = vpop.eup %998 }
 0x1b0   : > { %v524_v20 = vmul.f32 0.5, %v886_v56  ;;  %v501_v46 = vand.u32 2147483647, %v495_v54  ;;  %v542_v21 = vsub.f32 1.0, %v886_v56  ;;  %v529_v9 = vmul.f32 %v523_v55, %v493_v34 }
 0x1b1   : > { %v553_v2 = vmul.f32 %v891_v14, %v541_v15  ;;  %v720_v51 = vmul.f32 %v1334_v58, %v714_v36  ;;  %v715_v52 = vsub.f32 %v661_v45, %v1380_v59  ;;  %v662_v5 = vadd.f32 %v655_v10, %v1241_v47 }
 0x1b2   : > { %v530_v57 = vmul.f32 %v524_v20, %v494_v38  ;;  %vm507_vm2 = vcmp.lt.f32.partialorder %v501_v46, 1.0  ;;  %v535_v61 = vmul.f32 %v529_v9, %v493_v34  ;;  %v554_v12 = vmul.f32 %v892_v7, %v542_v21 }
 0x1b3   : > { %v887_v0 = vsel %vm507_vm2, 1.0, %v1047_v23  ;;  %v893_v17 = vadd.f32 -0.5, %v501_v46  ;;  %v728_v44 = vsel %vm724_vm8, %v720_v51, 0.0  ;;  %v721_v4 = vmul.f32 %v1340_v60, %v715_v52 }
 0x1b4   : > { %v536_v28 = vmul.f32 %v530_v57, %v494_v38  ;;  %v525_v29 = vmul.f32 0.5, %v887_v0  ;;  %v543_v11 = vsub.f32 1.0, %v887_v0  ;;  %v559_v13 = vadd.f32 %v553_v2, %v535_v61 }
 0x1b5   : > { %v716_v37 = vsub.f32 %v662_v5, %v1385_v1  ;;  %v729_v62 = vadd.f32 %v728_v44, %v1362_v42  ;;  %v730_v19 = vsel %vm724_vm8, %v721_v4, 0.0 }
 0x1b6   : > { %v531_v16 = vmul.f32 %v525_v29, %v495_v54  ;;  %v560_v24 = vadd.f32 %v554_v12, %v536_v28  ;;  %v568_v26 = vsel %vm562_vm0, %v559_v13, 0.0  ;;  %v555_v31 = vmul.f32 %v893_v17, %v543_v11 }
 0x1b7   : > { %v569_v32 = vadd.f32 %v568_v26, %v567_v25  ;;  %v722_v41 = vmul.f32 %v1347_v27, %v716_v37  ;;  %v731_v59 = vadd.f32 %v730_v19, %v729_v62 }
 0x1b8   : > { %v537_v30 = vmul.f32 %v531_v16, %v495_v54  ;;  %v570_v23 = vsel %vm562_vm0, %v560_v24, 0.0  ;;  %v657_v54 = vmul.f32 0.6931472, %v999_v53 }
 0x1b9   : > { %v571_v34 = vadd.f32 %v570_v23, %v569_v32  ;;  %v732_v47 = vsel %vm724_vm8, %v722_v41, 0.0 }
 0x1ba   : > { %v561_v33 = vadd.f32 %v555_v31, %v537_v30  ;;  %v663_v58 = vadd.f32 %v657_v54, %v1243_v48  ;;  %v733_v56 = vadd.f32 %v732_v47, %v731_v59 }
 0x1bc   : > { %v572_v35 = vsel %vm562_vm0, %v561_v33, 0.0 }
 0x1bd   : > { %v573_v38 = vadd.f32 %v572_v35, %v571_v34 }
 0x1bf   : > { %574 = vadd.xlane.f32.xlu1 %v573_v38 }
 0x1d6   : > { %v711_v18 = vpop.xlane.xlu1 %710 }
 0x1d7   : > { %v717_v55 = vsub.f32 %v663_v58, %v711_v18 }
 0x1d9   : > { %v723_v15 = vmul.f32 %v1350_v63, %v717_v55 }
 0x1da   : > { %v350_v20 = vpop.xlane.xlu1 %349 }
 0x1db   : > { %v734_v60 = vsel %vm724_vm8, %v723_v15, 0.0  ;;  %v351_v1 = vrot.slane %v350_v20, 4 }
 0x1dc   : > { %v325_v46 = vpop.xlane.xlu0 %324  ;;  %v735_v42 = vadd.f32 %v734_v60, %v733_v56 }
 0x1dd   : > { %v326_v21 = vrot.slane %v325_v46, 4  ;;  %v352_v9 = vadd.f32 %v351_v1, %v350_v20 }
 0x1de   : > { %736 = vadd.xlane.f32.xlu1 %v735_v42  ;;  %v374_v27 = vpop.xlane.xlu1 %373 }
 0x1df   : > { %v327_v14 = vadd.f32 %v326_v21, %v325_v46  ;;  %v353_v48 = vrot.slane %v352_v9, 2  ;;  %v375_v6 = vrot.slane %v374_v27, 4 }
 0x1e0   : > { %v757_v31 = vpop.xlane.xlu0 %756 }
 0x1e1   : > { %v328_v57 = vrot.slane %v327_v14, 2  ;;  %v376_v7 = vadd.f32 %v375_v6, %v374_v27  ;;  %v354_v22 = vadd.f32 %v353_v48, %v352_v9  ;;  %v758_v32 = vrot.slane %v757_v31, 4 }
 0x1e3   : > { %v329_v63 = vadd.f32 %v328_v57, %v327_v14  ;;  %v377_v61 = vrot.slane %v376_v7, 2  ;;  %v355_v0 = vrot.slane %v354_v22, 1  ;;  %v759_v23 = vadd.f32 %v758_v32, %v757_v31 }
 0x1e5   : > { %v330_v2 = vrot.slane %v329_v63, 1  ;;  %v356_v3 = vadd.f32 %v355_v0, %v354_v22  ;;  %v378_v28 = vadd.f32 %v377_v61, %v376_v7  ;;  %v760_v34 = vrot.slane %v759_v23, 2 }
 0x1e7   : > { %v331_v29 = vadd.f32 %v330_v2, %v329_v63  ;;  %v379_v11 = vrot.slane %v378_v28, 1  ;;  %v761_v39 = vadd.f32 %v760_v34, %v759_v23 }
 0x1e9   : > { %899 = vpush %v331_v29  ;;  %v380_v12 = vadd.f32 %v379_v11, %v378_v28  ;;  %v762_v8 = vrot.slane %v761_v39, 1 }
 0x1ea   : > { %901 = vpush %v356_v3 }
 0x1eb   : > { %903 = vpush %v380_v12  ;;  %v763_v45 = vadd.f32 %v762_v8, %v761_v39 }
 0x21a   : > { %s1422_s26 = spop %899 }
 0x21b   : > { %s1424_s27 = spop %901 }
 0x21c   : > { %s904_s28 = spop %903 }
 0x21d   : > { %v765_v33 = vstv %s904_s28 }
 0x21e   : > { %1000 = vrcp.f32 %v765_v33 }
 0x228   : > { %v1001_v10 = vpop.eup %1000 }
 0x24c   : > { %v575_v13 = vpop.xlane.xlu1 %574 }
 0x24d   : > { %v576_v16 = vrot.slane %v575_v13, 4 }
 0x24f   : > { %v577_v17 = vadd.f32 %v576_v16, %v575_v13 }
 0x251   : > { %v578_v24 = vrot.slane %v577_v17, 2 }
 0x253   : > { %v579_v25 = vadd.f32 %v578_v24, %v577_v17 }
 0x255   : > { %v580_v26 = vrot.slane %v579_v25, 1 }
 0x257   : > { %v581_v30 = vadd.f32 %v580_v26, %v579_v25 }
 0x259   : > { %905 = vpush %v581_v30 }
 0x26b   : > { %v737_v35 = vpop.xlane.xlu1 %736 }
 0x26c   : > { %v738_v38 = vrot.slane %v737_v35, 4 }
 0x26e   : > { %v739_v43 = vadd.f32 %v738_v38, %v737_v35 }
 0x270   : > { %v740_v40 = vrot.slane %v739_v43, 2 }
 0x272   : > { %v741_v49 = vadd.f32 %v740_v40, %v739_v43 }
 0x274   : > { %v742_v36 = vrot.slane %v741_v49, 1 }
 0x276   : > { %v743_v50 = vadd.f32 %v742_v36, %v741_v49 }
 0x278   : > { %907 = vpush %v743_v50 }
 0x279   : > { %909 = vpush %v763_v45 }
 0x27a   : > { %911 = vpush %v1001_v10 }
 0x28a   : > { %s906_s30 = spop %905 }
 0x2a9   : > { %s908_s5 = spop %907 }
 0x2aa   : > { %s910_s6 = spop %909 }
 0x2ab   : > { %v773_v51 = vstv %s910_s6  ;;  %s912_s7 = spop %911 }
 0x2ac   : > { %1002 = vrcp.f32 %v773_v51  ;;  %s768_s8 = smul.f32 %s912_s7, %s1422_s26 }
 0x2ad   : > { %s772_s9 = smul.f32 %s912_s7, %s1424_s27 }
 0x2ae   : > { %784 = sst [smem:[#allocation6]] %s768_s8 }
 0x2af   : > { %s781_s10 = sadd.f32 %s772_s9, %s768_s8 }
 0x2b0   : > { %786 = sst [smem:[#allocation6 + $0x1]] %s772_s9 }
 0x2b1   : > { %795 = sst [smem:[#allocation6 + $0x5]] %s781_s10 }
 0x2b6   : > { %v1003_v52 = vpop.eup %1002 }
 0x2b7   : > { %913 = vpush %v1003_v52 }
 0x2e8   : > { %s914_s11 = spop %913 }
 0x2e9   : > { %s776_s12 = smul.f32 %s914_s11, %s906_s30 }
 0x2ea   : > { %s780_s13 = smul.f32 %s914_s11, %s908_s5 }
 0x2eb   : > { %788 = sst [smem:[#allocation6 + $0x2]] %s776_s12 }
 0x2ec   : > { %s782_s14 = sadd.f32 %s780_s13, %s776_s12 }
 0x2ed   : > { %790 = sst [smem:[#allocation6 + $0x3]] %s780_s13 }
 0x2ee   : > { %s791_s15 = sadd.f32 %s782_s14, %s781_s10 }
 0x2ef   : > { %797 = sst [smem:[#allocation6 + $0x6]] %s782_s14 }
 0x2f0   : > { %793 = sst [smem:[#allocation6 + $0x4]] %s791_s15 }
 0x2f1 PF: > { %p919_p10 = scmp.eq.s32.totalorder %s1092_s18, 2  ;;  %s1004_s21 = scalar_lea.hbm %s1455_s4, 16 }
 0x2f2   : > { %p1005_p11 = scmp.ne.s32.totalorder %s1455_s4, %s1004_s21  ;;  %p1010_p0 = scmp.lt.u32.totalorder %s1004_s21, %s1455_s4 }
 0x2f4   : > { %p1006_p12 = pnand %p1005_p11, %p919_p10 }
 0x2f6   : > { %p1007_p13 = pneg %p1006_p12 }
 0x2f8   : > { %p1012_p1 = pnand %p1010_p0, %p1007_p13 }
 0x2fa   : > { %1015 = shalt.err (!%p1012_p1)
}
 0x2fb   : > { %s1050_s27 = smov [#allocation6]  }
 0x2fc   : > { %916 = dma.smem_to_hbm (%p919_p10), %s1050_s27, 16, %s1455_s4, [#allocation7]  }
 0x2fd   : > { %1029 = dma.done.wait (%p919_p10), [#allocation7], 16  }
 0x2fe   : > { %1031 = vsyncadd (%p919_p10), [#allocation7], 4294967280 }
 0x2ff   : > { %813 = sfence }
 0x300 PF: > { %p12_p2 = scmp.ge.s32.totalorder %s1095_s19, 5   ;;  %s1458_s15 = smov %s1038_s16 }
 0x301   : > { %s1459_s16 = smov %s1104_s22  ;;  %s1460_s17 = smov %s1095_s19 }
 0x302   :  { %14 = sbr.rel (!%p12_p2) target bundleno = 2 (0x2), region = 110 }
 0x309   :  { %819 = vsyncpa [#allocation7], 1 }
 0x30a   :  { %821 = vsyncpa [#allocation7 + $0x1], 1 }

</bundles_post_ra>
